<compile_context>
chip_gen: v7x
topology: tpu7x:2x2x1
jax: 0.10.0
libtpu: 0.0.40
codegen_flags: <defaults>
</compile_context>

<pallas_src>
import functools

import jax
import jax.numpy as jnp
from jax.experimental import pallas as pl
from jax.experimental.pallas import tpu as pltpu


def _pooling_block_kernel(x_ref, o_ref):
    # x_ref / o_ref: (H, W, LANE_TILE) block; lane dim = flattened N*C (padded).
    x = x_ref[...]
    H, W, L = x.shape
    zero = jnp.zeros((), x.dtype)
    zcol = jnp.zeros((H, 1, L), x.dtype)   # neutral boundary taps (== -inf pad + ReLU)
    zrow = jnp.zeros((1, W, L), x.dtype)

    # Pass 1: max over the three W taps; the 0 floor folds the ReLU in and
    # makes the zero boundary columns exactly equivalent to -inf pad + ReLU.
    left = jnp.concatenate([zcol, x[:, : W - 1, :]], axis=1)    # x[h, w-1]
    right = jnp.concatenate([x[:, 1:, :], zcol], axis=1)        # x[h, w+1]
    cm = jnp.maximum(jnp.maximum(x, zero), jnp.maximum(left, right))

    # Pass 2: max over the three H taps of the column-max.
    up = jnp.concatenate([zrow, cm[: H - 1]], axis=0)           # cm[h-1]
    down = jnp.concatenate([cm[1:], zrow], axis=0)              # cm[h+1]
    o_ref[...] = jnp.maximum(jnp.maximum(cm, up), down)


@functools.partial(jax.jit, static_argnames=("ksize", "stride", "pad", "lane_tile"))
def pooling_block(x, *, ksize=3, stride=1, pad=1, lane_tile=128):
    """MaxPool2d(3, stride=1, padding=1) + ReLU on NCHW input."""
    assert (ksize, stride, pad) == (3, 1, 1), \
        "kernel specialized for the PoolingBlock defaults (ksize=3, stride=1, pad=1)"
    N, C, H, W = x.shape
    L = N * C
    L_pad = ((L + lane_tile - 1) // lane_tile) * lane_tile

    # (N, C, H, W) -> (H, W, N*C): lane dim carries N*C (never shifted by the
    # pooling window), padded to a multiple of 128 for lane-dense stores.
    xt = jnp.transpose(x, (2, 3, 0, 1)).reshape(H, W, L)
    if L_pad != L:
        xt = jnp.pad(xt, ((0, 0), (0, 0), (0, L_pad - L)))

    out = pl.pallas_call(
        _pooling_block_kernel,
        out_shape=jax.ShapeDtypeStruct((H, W, L_pad), x.dtype),
        grid=(L_pad // lane_tile,),
        in_specs=[pl.BlockSpec((H, W, lane_tile), lambda l: (0, 0, l))],
        out_specs=pl.BlockSpec((H, W, lane_tile), lambda l: (0, 0, l)),
        compiler_params=pltpu.CompilerParams(
            dimension_semantics=("parallel",)),
    )(xt)

    out = out[:, :, :L].reshape(H, W, N, C)
    return jnp.transpose(out, (2, 3, 0, 1))


def _reference(x, ksize=3, pad=1):
    # Pure-JAX reference matching PyTorch MaxPool2d (-inf padding) + ReLU.
    neg = jnp.finfo(x.dtype).min
    xp = jnp.pad(x, ((0, 0), (0, 0), (pad, pad), (pad, pad)),
                 constant_values=neg)
    H, W = x.shape[-2], x.shape[-1]
    m = xp[:, :, 0:H, 0:W]
    for di in range(ksize):
        for dj in range(ksize):
            m = jnp.maximum(m, xp[:, :, di:di + H, dj:dj + W])
    return jnp.maximum(m, 0.0)


if __name__ == "__main__":
    key = jax.random.PRNGKey(0)
    x = jax.random.normal(key, (2, 4, 16, 16), dtype=jnp.float32)

    out = jax.block_until_ready(pooling_block(x))
    ref = _reference(x)

    assert out.shape == (2, 4, 16, 16)
    assert jnp.allclose(out, ref, atol=1e-6, rtol=1e-6)
    print("KERNEL_OK")
</pallas_src>

<mosaic_0001>
module attributes {stable_mosaic.version = 11 : i64} {
  func.func @_pooling_block_kernel(%arg0: i32, %arg1: memref<16x16x128xf32, #tpu.memory_space<vmem>>, %arg2: memref<16x16x128xf32, #tpu.memory_space<vmem>>) attributes {dimension_semantics = [#tpu.dimension_semantics<parallel>], iteration_bounds = array<i64: 1>, scalar_prefetch = 0 : i64, scratch_operands = 0 : i64, tpu.core_type = #tpu.core_type<tc>, window_params = [{transform_indices = @transform_0, window_bounds = array<i64: 16, 16, 128>}, {transform_indices = @transform_1, window_bounds = array<i64: 16, 16, 128>}]} {
    %c0 = arith.constant 0 : index
    %c0_0 = arith.constant 0 : index
    %c0_1 = arith.constant 0 : index
    %0 = vector.load %arg1[%c0, %c0_0, %c0_1] : memref<16x16x128xf32, #tpu.memory_space<vmem>>, vector<16x16x128xf32>
    %cst = arith.constant 0.000000e+00 : f32
    %1 = vector.broadcast %cst : f32 to vector<16x1x128xf32>
    %cst_2 = arith.constant 0.000000e+00 : f32
    %2 = vector.broadcast %cst_2 : f32 to vector<1x16x128xf32>
    %3 = vector.extract_strided_slice %0 {offsets = [0, 0, 0], sizes = [16, 15, 128], strides = [1, 1, 1]} : vector<16x16x128xf32> to vector<16x15x128xf32>
    %4 = tpu.concatenate %1, %3 in 1 : vector<16x1x128xf32>, vector<16x15x128xf32> -> vector<16x16x128xf32>
    %5 = vector.extract_strided_slice %0 {offsets = [0, 1, 0], sizes = [16, 15, 128], strides = [1, 1, 1]} : vector<16x16x128xf32> to vector<16x15x128xf32>
    %6 = tpu.concatenate %5, %1 in 1 : vector<16x15x128xf32>, vector<16x1x128xf32> -> vector<16x16x128xf32>
    %cst_3 = arith.constant 0.000000e+00 : f32
    %7 = vector.broadcast %cst_3 : f32 to vector<16x16x128xf32>
    %8 = arith.maximumf %0, %7 : vector<16x16x128xf32>
    %9 = arith.maximumf %4, %6 : vector<16x16x128xf32>
    %10 = arith.maximumf %8, %9 : vector<16x16x128xf32>
    %11 = vector.extract_strided_slice %10 {offsets = [0, 0, 0], sizes = [15, 16, 128], strides = [1, 1, 1]} : vector<16x16x128xf32> to vector<15x16x128xf32>
    %12 = tpu.concatenate %2, %11 in 0 : vector<1x16x128xf32>, vector<15x16x128xf32> -> vector<16x16x128xf32>
    %13 = vector.extract_strided_slice %10 {offsets = [1, 0, 0], sizes = [15, 16, 128], strides = [1, 1, 1]} : vector<16x16x128xf32> to vector<15x16x128xf32>
    %14 = tpu.concatenate %13, %2 in 0 : vector<15x16x128xf32>, vector<1x16x128xf32> -> vector<16x16x128xf32>
    %15 = arith.maximumf %10, %12 : vector<16x16x128xf32>
    %16 = arith.maximumf %15, %14 : vector<16x16x128xf32>
    %c0_4 = arith.constant 0 : index
    %c0_5 = arith.constant 0 : index
    %c0_6 = arith.constant 0 : index
    %17 = vector.load %arg2[%c0_4, %c0_5, %c0_6] : memref<16x16x128xf32, #tpu.memory_space<vmem>>, vector<16x16x128xf32>
    tpu.vector_store %arg2[%c0_4, %c0_5, %c0_6], %16 {strides = array<i32>} : memref<16x16x128xf32, #tpu.memory_space<vmem>>, vector<16x16x128xf32>,
    return
  }
  func.func @transform_0(%arg0: i32) -> (i32, i32, i32) {
    %c0_i32 = arith.constant 0 : i32
    %c0_i32_0 = arith.constant 0 : i32
    %c0_i32_1 = arith.constant 0 : i32
    return %c0_i32, %c0_i32_0, %arg0 : i32, i32, i32
  }
  func.func @transform_1(%arg0: i32) -> (i32, i32, i32) {
    %c0_i32 = arith.constant 0 : i32
    %c0_i32_0 = arith.constant 0 : i32
    %c0_i32_1 = arith.constant 0 : i32
    return %c0_i32, %c0_i32_0, %arg0 : i32, i32, i32
  }
}

</mosaic_0001>

<bundles_post_ra>
// kernel: pooling_block.1
= control target key start
LH: loop header
LB: loop body
LE: loop exit
PB: predicated region body
PF: predicated region fallthrough
CT: control target
= control target key end

     0   :  { %vm72_vm0 = vcmask 1040384   ;;  %vm169_vm1 = vcmask 1046528   ;;  %s733_s0 = inlined_call_operand.vmem [shape: f32[16,16,128], index: 0, kind: input, shape index: {}]   ;;  %s734_s1 = inlined_call_operand.vmem [shape: f32[16,16,128], index: 1, kind: output, shape index: {}]  }
   0x1   :  { %v8_v0 = vld [vmem:[%s733_s0] sm:$0xff]  ;;  %v9_v1 = vld [vmem:[%s733_s0 + $0x8] sm:$0xff]  ;;  %v10_v2 = vld [vmem:[%s733_s0 + $0x10] sm:$0xff] }
   0x2   :  { %v11_v3 = vld [vmem:[%s733_s0 + $0x18] sm:$0xff]  ;;  %v73_v4 = vrot.slane %v8_v0, 7  ;;  %v76_v5 = vrot.slane %v10_v2, 7  ;;  %v170_v6 = vrot.slane %v8_v0, 1  ;;  %v171_v7 = vrot.slane %v9_v1, 1  ;;  %v12_v20 = vld [vmem:[%s733_s0 + $0x20] sm:$0xff] }
   0x3   :  { %v173_v8 = vrot.slane %v10_v2, 1  ;;  %v174_v9 = vrot.slane %v11_v3, 1  ;;  %v266_v10 = vmax.f32 %v8_v0, 0.0  ;;  %v268_v11 = vmax.f32 %v10_v2, 0.0  ;;  %v13_v25 = vld [vmem:[%s733_s0 + $0x28] sm:$0xff]  ;;  %v14_v42 = vld [vmem:[%s733_s0 + $0x30] sm:$0xff] }
   0x4   :  { %v153_v12 = vsel %vm72_vm0, 0.0, %v73_v4  ;;  %v154_v13 = vsel %vm72_vm0, 0.0, %v76_v5  ;;  %v172_v14 = vsel %vm169_vm1, %v170_v6, %v171_v7  ;;  %v74_v15 = vrot.slane %v9_v1, 7  ;;  %v15_v47 = vld [vmem:[%s733_s0 + $0x38] sm:$0xff]  ;;  %v16_v52 = vld [vmem:[%s733_s0 + $0x40] sm:$0xff]  ;;  %v17_v0 = vld [vmem:[%s733_s0 + $0x48] sm:$0xff] }
   0x5   :  { %v175_v16 = vsel %vm169_vm1, %v173_v8, %v174_v9  ;;  %v298_v17 = vmax.f32 %v153_v12, %v172_v14  ;;  %v77_v18 = vrot.slane %v11_v3, 7  ;;  %v250_v19 = vsel %vm169_vm1, %v171_v7, 0.0 }
   0x6   :  { %v300_v21 = vmax.f32 %v154_v13, %v175_v16  ;;  %v75_v22 = vsel %vm72_vm0, %v73_v4, %v74_v15  ;;  %v251_v23 = vsel %vm169_vm1, %v174_v9, 0.0  ;;  %v267_v24 = vmax.f32 %v9_v1, 0.0 }
   0x7   :  { %v330_v26 = vmax.f32 %v266_v10, %v298_v17  ;;  %v78_v27 = vsel %vm72_vm0, %v76_v5, %v77_v18  ;;  %v269_v28 = vmax.f32 %v11_v3, 0.0  ;;  %v299_v29 = vmax.f32 %v75_v22, %v250_v19  ;;  %v18_v10 = vld [vmem:[%s733_s0 + $0x50] sm:$0xff]  ;;  %v19_v22 = vld [vmem:[%s733_s0 + $0x58] sm:$0xff] }
   0x8   :  { %v498_v30 = vmax.f32 %v268_v11, %v300_v21  ;;  %v301_v31 = vmax.f32 %v78_v27, %v251_v23  ;;  %v79_v32 = vrot.slane %v12_v20, 7  ;;  %v176_v33 = vrot.slane %v12_v20, 1 }
   0x9   :  { %v362_v34 = vmax.f32 %v330_v26, 0.0  ;;  %v331_v35 = vmax.f32 %v267_v24, %v299_v29  ;;  %v177_v36 = vrot.slane %v13_v25, 1  ;;  %v270_v37 = vmax.f32 %v12_v20, 0.0 }
   0xa   :  { %v333_v38 = vmax.f32 %v269_v28, %v301_v31  ;;  %v155_v39 = vsel %vm72_vm0, 0.0, %v79_v32  ;;  %v364_v40 = vmax.f32 %v498_v30, %v330_v26  ;;  %v80_v41 = vrot.slane %v13_v25, 7  ;;  %v20_v28 = vld [vmem:[%s733_s0 + $0x60] sm:$0xff] }
   0xb   :  { %v394_v43 = vmax.f32 %v362_v34, %v498_v30  ;;  %v363_v44 = vmax.f32 %v331_v35, 0.0  ;;  %v178_v45 = vsel %vm169_vm1, %v176_v33, %v177_v36  ;;  %v252_v46 = vsel %vm169_vm1, %v177_v36, 0.0 }
   0xc   :  { %v302_v48 = vmax.f32 %v155_v39, %v178_v45  ;;  %v81_v49 = vsel %vm72_vm0, %v79_v32, %v80_v41  ;;  %v271_v50 = vmax.f32 %v13_v25, 0.0  ;;  %v365_v51 = vmax.f32 %v333_v38, %v331_v35 }
   0xd   :  { %426 = vst [vmem:[%s734_s1] sm:$0xff] %v394_v43  ;;  %v395_v53 = vmax.f32 %v363_v44, %v333_v38  ;;  %v303_v54 = vmax.f32 %v81_v49, %v252_v46  ;;  %v82_v55 = vrot.slane %v14_v42, 7  ;;  %v179_v56 = vrot.slane %v14_v42, 1 }
   0xe   :  { %v334_v57 = vmax.f32 %v270_v37, %v302_v48  ;;  %v180_v58 = vrot.slane %v15_v47, 1  ;;  %v272_v59 = vmax.f32 %v14_v42, 0.0  ;;  %v83_v60 = vrot.slane %v15_v47, 7 }
   0xf   :  { %427 = vst [vmem:[%s734_s1 + $0x8] sm:$0xff] %v395_v53  ;;  %v335_v61 = vmax.f32 %v271_v50, %v303_v54  ;;  %v156_v62 = vsel %vm72_vm0, 0.0, %v82_v55  ;;  %v273_v63 = vmax.f32 %v15_v47, 0.0  ;;  %v85_v1 = vrot.slane %v16_v52, 7  ;;  %v22_v50 = vld [vmem:[%s733_s0 + $0x70] sm:$0xff] }
  0x10   :  { %v396_v2 = vmax.f32 %v364_v40, %v334_v57  ;;  %v181_v3 = vsel %vm169_vm1, %v179_v56, %v180_v58  ;;  %v366_v4 = vmax.f32 %v334_v57, %v498_v30  ;;  %v84_v5 = vsel %vm72_vm0, %v82_v55, %v83_v60  ;;  %v21_v40 = vld [vmem:[%s733_s0 + $0x68] sm:$0xff] }
  0x11   :  { %v397_v6 = vmax.f32 %v365_v51, %v335_v61  ;;  %v304_v7 = vmax.f32 %v156_v62, %v181_v3  ;;  %v253_v8 = vsel %vm169_vm1, %v180_v58, 0.0  ;;  %v367_v9 = vmax.f32 %v335_v61, %v333_v38  ;;  %v23_v62 = vld [vmem:[%s733_s0 + $0x78] sm:$0xff] }
  0x12   :  { %428 = vst [vmem:[%s734_s1 + $0x10] sm:$0xff] %v396_v2  ;;  %v305_v11 = vmax.f32 %v84_v5, %v253_v8  ;;  %v157_v12 = vsel %vm72_vm0, 0.0, %v85_v1  ;;  %v182_v13 = vrot.slane %v16_v52, 1  ;;  %v183_v14 = vrot.slane %v17_v0, 1 }
  0x13   :  { %429 = vst [vmem:[%s734_s1 + $0x18] sm:$0xff] %v397_v6  ;;  %v336_v15 = vmax.f32 %v272_v59, %v304_v7  ;;  %v274_v16 = vmax.f32 %v16_v52, 0.0  ;;  %v86_v17 = vrot.slane %v17_v0, 7  ;;  %v275_v18 = vmax.f32 %v17_v0, 0.0 }
  0x14   :  { %v337_v19 = vmax.f32 %v273_v63, %v305_v11  ;;  %v184_v20 = vsel %vm169_vm1, %v182_v13, %v183_v14  ;;  %v254_v21 = vsel %vm169_vm1, %v183_v14, 0.0  ;;  %v88_v23 = vrot.slane %v18_v10, 7 }
  0x15   :  { %v398_v24 = vmax.f32 %v366_v4, %v336_v15  ;;  %v306_v25 = vmax.f32 %v157_v12, %v184_v20  ;;  %v368_v26 = vmax.f32 %v336_v15, %v334_v57  ;;  %v87_v27 = vsel %vm72_vm0, %v85_v1, %v86_v17  ;;  %v24_v4 = vld [vmem:[%s733_s0 + $0x80] sm:$0xff] }
  0x16   :  { %v399_v29 = vmax.f32 %v367_v9, %v337_v19  ;;  %v307_v30 = vmax.f32 %v87_v27, %v254_v21  ;;  %v369_v31 = vmax.f32 %v337_v19, %v335_v61  ;;  %v158_v32 = vsel %vm72_vm0, 0.0, %v88_v23 }
  0x17   :  { %430 = vst [vmem:[%s734_s1 + $0x20] sm:$0xff] %v398_v24  ;;  %v338_v33 = vmax.f32 %v274_v16, %v306_v25  ;;  %v185_v34 = vrot.slane %v18_v10, 1  ;;  %v186_v35 = vrot.slane %v19_v22, 1  ;;  %v276_v36 = vmax.f32 %v18_v10, 0.0  ;;  %v25_v16 = vld [vmem:[%s733_s0 + $0x88] sm:$0xff] }
  0x18   :  { %431 = vst [vmem:[%s734_s1 + $0x28] sm:$0xff] %v399_v29  ;;  %v339_v37 = vmax.f32 %v275_v18, %v307_v30  ;;  %v89_v38 = vrot.slane %v19_v22, 7  ;;  %v277_v39 = vmax.f32 %v19_v22, 0.0  ;;  %v91_v41 = vrot.slane %v20_v28, 7 }
  0x19   :  { %v400_v42 = vmax.f32 %v368_v26, %v338_v33  ;;  %v187_v43 = vsel %vm169_vm1, %v185_v34, %v186_v35  ;;  %v370_v44 = vmax.f32 %v338_v33, %v336_v15  ;;  %v255_v45 = vsel %vm169_vm1, %v186_v35, 0.0  ;;  %v26_v26 = vld [vmem:[%s733_s0 + $0x90] sm:$0xff] }
  0x1a   :  { %v401_v46 = vmax.f32 %v369_v31, %v339_v37  ;;  %v308_v47 = vmax.f32 %v158_v32, %v187_v43  ;;  %v90_v48 = vsel %vm72_vm0, %v88_v23, %v89_v38  ;;  %v371_v49 = vmax.f32 %v339_v37, %v337_v19  ;;  %v27_v38 = vld [vmem:[%s733_s0 + $0x98] sm:$0xff] }
  0x1b   :  { %432 = vst [vmem:[%s734_s1 + $0x30] sm:$0xff] %v400_v42  ;;  %v309_v51 = vmax.f32 %v90_v48, %v255_v45  ;;  %v159_v52 = vsel %vm72_vm0, 0.0, %v91_v41  ;;  %v188_v53 = vrot.slane %v20_v28, 1  ;;  %v189_v54 = vrot.slane %v21_v40, 1 }
  0x1c   :  { %433 = vst [vmem:[%s734_s1 + $0x38] sm:$0xff] %v401_v46  ;;  %v340_v55 = vmax.f32 %v276_v36, %v308_v47  ;;  %v278_v56 = vmax.f32 %v20_v28, 0.0  ;;  %v92_v57 = vrot.slane %v21_v40, 7  ;;  %v279_v58 = vmax.f32 %v21_v40, 0.0 }
  0x1d   :  { %v341_v59 = vmax.f32 %v277_v39, %v309_v51  ;;  %v190_v60 = vsel %vm169_vm1, %v188_v53, %v189_v54  ;;  %v256_v61 = vsel %vm169_vm1, %v189_v54, 0.0  ;;  %v94_v63 = vrot.slane %v22_v50, 7 }
  0x1e   :  { %v402_v0 = vmax.f32 %v370_v44, %v340_v55  ;;  %v310_v1 = vmax.f32 %v159_v52, %v190_v60  ;;  %v372_v2 = vmax.f32 %v340_v55, %v338_v33  ;;  %v93_v3 = vsel %vm72_vm0, %v91_v41, %v92_v57  ;;  %v28_v44 = vld [vmem:[%s733_s0 + $0xa0] sm:$0xff] }
  0x1f   :  { %v403_v5 = vmax.f32 %v371_v49, %v341_v59  ;;  %v311_v6 = vmax.f32 %v93_v3, %v256_v61  ;;  %v373_v7 = vmax.f32 %v341_v59, %v339_v37  ;;  %v160_v8 = vsel %vm72_vm0, 0.0, %v94_v63 }
  0x20   :  { %434 = vst [vmem:[%s734_s1 + $0x40] sm:$0xff] %v402_v0  ;;  %v342_v9 = vmax.f32 %v278_v56, %v310_v1  ;;  %v191_v10 = vrot.slane %v22_v50, 1  ;;  %v192_v11 = vrot.slane %v23_v62, 1  ;;  %v280_v12 = vmax.f32 %v22_v50, 0.0  ;;  %v29_v56 = vld [vmem:[%s733_s0 + $0xa8] sm:$0xff] }
  0x21   :  { %435 = vst [vmem:[%s734_s1 + $0x48] sm:$0xff] %v403_v5  ;;  %v343_v13 = vmax.f32 %v279_v58, %v311_v6  ;;  %v95_v14 = vrot.slane %v23_v62, 7  ;;  %v281_v15 = vmax.f32 %v23_v62, 0.0  ;;  %v97_v17 = vrot.slane %v24_v4, 7 }
  0x22   :  { %v404_v18 = vmax.f32 %v372_v2, %v342_v9  ;;  %v193_v19 = vsel %vm169_vm1, %v191_v10, %v192_v11  ;;  %v374_v20 = vmax.f32 %v342_v9, %v340_v55  ;;  %v257_v21 = vsel %vm169_vm1, %v192_v11, 0.0  ;;  %v30_v2 = vld [vmem:[%s733_s0 + $0xb0] sm:$0xff] }
  0x23   :  { %v405_v22 = vmax.f32 %v373_v7, %v343_v13  ;;  %v312_v23 = vmax.f32 %v160_v8, %v193_v19  ;;  %v96_v24 = vsel %vm72_vm0, %v94_v63, %v95_v14  ;;  %v375_v25 = vmax.f32 %v343_v13, %v341_v59  ;;  %v31_v14 = vld [vmem:[%s733_s0 + $0xb8] sm:$0xff] }
  0x24   :  { %436 = vst [vmem:[%s734_s1 + $0x50] sm:$0xff] %v404_v18  ;;  %v313_v27 = vmax.f32 %v96_v24, %v257_v21  ;;  %v161_v28 = vsel %vm72_vm0, 0.0, %v97_v17  ;;  %v194_v29 = vrot.slane %v24_v4, 1  ;;  %v195_v30 = vrot.slane %v25_v16, 1 }
  0x25   :  { %437 = vst [vmem:[%s734_s1 + $0x58] sm:$0xff] %v405_v22  ;;  %v344_v31 = vmax.f32 %v280_v12, %v312_v23  ;;  %v282_v32 = vmax.f32 %v24_v4, 0.0  ;;  %v98_v33 = vrot.slane %v25_v16, 7  ;;  %v283_v34 = vmax.f32 %v25_v16, 0.0 }
  0x26   :  { %v345_v35 = vmax.f32 %v281_v15, %v313_v27  ;;  %v196_v36 = vsel %vm169_vm1, %v194_v29, %v195_v30  ;;  %v258_v37 = vsel %vm169_vm1, %v195_v30, 0.0  ;;  %v100_v39 = vrot.slane %v26_v26, 7 }
  0x27   :  { %v406_v40 = vmax.f32 %v374_v20, %v344_v31  ;;  %v314_v41 = vmax.f32 %v161_v28, %v196_v36  ;;  %v376_v42 = vmax.f32 %v344_v31, %v342_v9  ;;  %v99_v43 = vsel %vm72_vm0, %v97_v17, %v98_v33  ;;  %v32_v20 = vld [vmem:[%s733_s0 + $0xc0] sm:$0xff] }
  0x28   :  { %v407_v45 = vmax.f32 %v375_v25, %v345_v35  ;;  %v315_v46 = vmax.f32 %v99_v43, %v258_v37  ;;  %v377_v47 = vmax.f32 %v345_v35, %v343_v13  ;;  %v162_v48 = vsel %vm72_vm0, 0.0, %v100_v39 }
  0x29   :  { %438 = vst [vmem:[%s734_s1 + $0x60] sm:$0xff] %v406_v40  ;;  %v346_v49 = vmax.f32 %v282_v32, %v314_v41  ;;  %v197_v50 = vrot.slane %v26_v26, 1  ;;  %v198_v51 = vrot.slane %v27_v38, 1  ;;  %v284_v52 = vmax.f32 %v26_v26, 0.0  ;;  %v33_v32 = vld [vmem:[%s733_s0 + $0xc8] sm:$0xff] }
  0x2a   :  { %439 = vst [vmem:[%s734_s1 + $0x68] sm:$0xff] %v407_v45  ;;  %v347_v53 = vmax.f32 %v283_v34, %v315_v46  ;;  %v101_v54 = vrot.slane %v27_v38, 7  ;;  %v285_v55 = vmax.f32 %v27_v38, 0.0  ;;  %v103_v57 = vrot.slane %v28_v44, 7 }
  0x2b   :  { %v408_v58 = vmax.f32 %v376_v42, %v346_v49  ;;  %v199_v59 = vsel %vm169_vm1, %v197_v50, %v198_v51  ;;  %v378_v60 = vmax.f32 %v346_v49, %v344_v31  ;;  %v259_v61 = vsel %vm169_vm1, %v198_v51, 0.0  ;;  %v34_v42 = vld [vmem:[%s733_s0 + $0xd0] sm:$0xff] }
  0x2c   :  { %v409_v62 = vmax.f32 %v377_v47, %v347_v53  ;;  %v316_v63 = vmax.f32 %v162_v48, %v199_v59  ;;  %v102_v0 = vsel %vm72_vm0, %v100_v39, %v101_v54  ;;  %v379_v1 = vmax.f32 %v347_v53, %v345_v35  ;;  %v35_v54 = vld [vmem:[%s733_s0 + $0xd8] sm:$0xff] }
  0x2d   :  { %440 = vst [vmem:[%s734_s1 + $0x70] sm:$0xff] %v408_v58  ;;  %v317_v3 = vmax.f32 %v102_v0, %v259_v61  ;;  %v163_v4 = vsel %vm72_vm0, 0.0, %v103_v57  ;;  %v200_v5 = vrot.slane %v28_v44, 1  ;;  %v201_v6 = vrot.slane %v29_v56, 1 }
  0x2e   :  { %441 = vst [vmem:[%s734_s1 + $0x78] sm:$0xff] %v409_v62  ;;  %v348_v7 = vmax.f32 %v284_v52, %v316_v63  ;;  %v286_v8 = vmax.f32 %v28_v44, 0.0  ;;  %v104_v9 = vrot.slane %v29_v56, 7  ;;  %v287_v10 = vmax.f32 %v29_v56, 0.0 }
  0x2f   :  { %v349_v11 = vmax.f32 %v285_v55, %v317_v3  ;;  %v202_v12 = vsel %vm169_vm1, %v200_v5, %v201_v6  ;;  %v260_v13 = vsel %vm169_vm1, %v201_v6, 0.0  ;;  %v106_v15 = vrot.slane %v30_v2, 7 }
  0x30   :  { %v410_v16 = vmax.f32 %v378_v60, %v348_v7  ;;  %v318_v17 = vmax.f32 %v163_v4, %v202_v12  ;;  %v380_v18 = vmax.f32 %v348_v7, %v346_v49  ;;  %v105_v19 = vsel %vm72_vm0, %v103_v57, %v104_v9  ;;  %v36_v60 = vld [vmem:[%s733_s0 + $0xe0] sm:$0xff] }
  0x31   :  { %v411_v21 = vmax.f32 %v379_v1, %v349_v11  ;;  %v319_v22 = vmax.f32 %v105_v19, %v260_v13  ;;  %v381_v23 = vmax.f32 %v349_v11, %v347_v53  ;;  %v164_v24 = vsel %vm72_vm0, 0.0, %v106_v15 }
  0x32   :  { %442 = vst [vmem:[%s734_s1 + $0x80] sm:$0xff] %v410_v16  ;;  %v350_v25 = vmax.f32 %v286_v8, %v318_v17  ;;  %v203_v26 = vrot.slane %v30_v2, 1  ;;  %v204_v27 = vrot.slane %v31_v14, 1  ;;  %v288_v28 = vmax.f32 %v30_v2, 0.0  ;;  %v37_v8 = vld [vmem:[%s733_s0 + $0xe8] sm:$0xff] }
  0x33   :  { %443 = vst [vmem:[%s734_s1 + $0x88] sm:$0xff] %v411_v21  ;;  %v351_v29 = vmax.f32 %v287_v10, %v319_v22  ;;  %v107_v30 = vrot.slane %v31_v14, 7  ;;  %v289_v31 = vmax.f32 %v31_v14, 0.0  ;;  %v109_v33 = vrot.slane %v32_v20, 7 }
  0x34   :  { %v412_v34 = vmax.f32 %v380_v18, %v350_v25  ;;  %v205_v35 = vsel %vm169_vm1, %v203_v26, %v204_v27  ;;  %v382_v36 = vmax.f32 %v350_v25, %v348_v7  ;;  %v261_v37 = vsel %vm169_vm1, %v204_v27, 0.0  ;;  %v38_v18 = vld [vmem:[%s733_s0 + $0xf0] sm:$0xff] }
  0x35   :  { %v413_v38 = vmax.f32 %v381_v23, %v351_v29  ;;  %v320_v39 = vmax.f32 %v164_v24, %v205_v35  ;;  %v108_v40 = vsel %vm72_vm0, %v106_v15, %v107_v30  ;;  %v383_v41 = vmax.f32 %v351_v29, %v349_v11  ;;  %v39_v30 = vld [vmem:[%s733_s0 + $0xf8] sm:$0xff] }
  0x36   :  { %444 = vst [vmem:[%s734_s1 + $0x90] sm:$0xff] %v412_v34  ;;  %v321_v43 = vmax.f32 %v108_v40, %v261_v37  ;;  %v165_v44 = vsel %vm72_vm0, 0.0, %v109_v33  ;;  %v206_v45 = vrot.slane %v32_v20, 1  ;;  %v207_v46 = vrot.slane %v33_v32, 1 }
  0x37   :  { %445 = vst [vmem:[%s734_s1 + $0x98] sm:$0xff] %v413_v38  ;;  %v352_v47 = vmax.f32 %v288_v28, %v320_v39  ;;  %v290_v48 = vmax.f32 %v32_v20, 0.0  ;;  %v110_v49 = vrot.slane %v33_v32, 7  ;;  %v291_v50 = vmax.f32 %v33_v32, 0.0 }
  0x38   :  { %v353_v51 = vmax.f32 %v289_v31, %v321_v43  ;;  %v208_v52 = vsel %vm169_vm1, %v206_v45, %v207_v46  ;;  %v262_v53 = vsel %vm169_vm1, %v207_v46, 0.0  ;;  %v112_v55 = vrot.slane %v34_v42, 7 }
  0x39   :  { %v414_v56 = vmax.f32 %v382_v36, %v352_v47  ;;  %v322_v57 = vmax.f32 %v165_v44, %v208_v52  ;;  %v384_v58 = vmax.f32 %v352_v47, %v350_v25  ;;  %v111_v59 = vsel %vm72_vm0, %v109_v33, %v110_v49 }
  0x3a   :  { %v415_v61 = vmax.f32 %v383_v41, %v353_v51  ;;  %v323_v62 = vmax.f32 %v111_v59, %v262_v53  ;;  %v385_v63 = vmax.f32 %v353_v51, %v351_v29  ;;  %v166_v0 = vsel %vm72_vm0, 0.0, %v112_v55 }
  0x3b   :  { %446 = vst [vmem:[%s734_s1 + $0xa0] sm:$0xff] %v414_v56  ;;  %v354_v1 = vmax.f32 %v290_v48, %v322_v57  ;;  %v209_v2 = vrot.slane %v34_v42, 1  ;;  %v210_v3 = vrot.slane %v35_v54, 1  ;;  %v292_v4 = vmax.f32 %v34_v42, 0.0 }
  0x3c   :  { %447 = vst [vmem:[%s734_s1 + $0xa8] sm:$0xff] %v415_v61  ;;  %v355_v5 = vmax.f32 %v291_v50, %v323_v62  ;;  %v113_v6 = vrot.slane %v35_v54, 7  ;;  %v293_v7 = vmax.f32 %v35_v54, 0.0  ;;  %v115_v9 = vrot.slane %v36_v60, 7 }
  0x3d   :  { %v416_v10 = vmax.f32 %v384_v58, %v354_v1  ;;  %v211_v11 = vsel %vm169_vm1, %v209_v2, %v210_v3  ;;  %v386_v12 = vmax.f32 %v354_v1, %v352_v47  ;;  %v263_v13 = vsel %vm169_vm1, %v210_v3, 0.0 }
  0x3e   :  { %v417_v14 = vmax.f32 %v385_v63, %v355_v5  ;;  %v324_v15 = vmax.f32 %v166_v0, %v211_v11  ;;  %v114_v16 = vsel %vm72_vm0, %v112_v55, %v113_v6  ;;  %v387_v17 = vmax.f32 %v355_v5, %v353_v51 }
  0x3f   :  { %448 = vst [vmem:[%s734_s1 + $0xb0] sm:$0xff] %v416_v10  ;;  %v325_v19 = vmax.f32 %v114_v16, %v263_v13  ;;  %v167_v20 = vsel %vm72_vm0, 0.0, %v115_v9  ;;  %v212_v21 = vrot.slane %v36_v60, 1  ;;  %v213_v22 = vrot.slane %v37_v8, 1 }
  0x40   :  { %449 = vst [vmem:[%s734_s1 + $0xb8] sm:$0xff] %v417_v14  ;;  %v356_v23 = vmax.f32 %v292_v4, %v324_v15  ;;  %v294_v24 = vmax.f32 %v36_v60, 0.0  ;;  %v116_v25 = vrot.slane %v37_v8, 7  ;;  %v295_v26 = vmax.f32 %v37_v8, 0.0 }
  0x41   :  { %v357_v27 = vmax.f32 %v293_v7, %v325_v19  ;;  %v214_v28 = vsel %vm169_vm1, %v212_v21, %v213_v22  ;;  %v264_v29 = vsel %vm169_vm1, %v213_v22, 0.0  ;;  %v118_v31 = vrot.slane %v38_v18, 7 }
  0x42   :  { %v418_v32 = vmax.f32 %v386_v12, %v356_v23  ;;  %v326_v33 = vmax.f32 %v167_v20, %v214_v28  ;;  %v388_v34 = vmax.f32 %v356_v23, %v354_v1  ;;  %v117_v35 = vsel %vm72_vm0, %v115_v9, %v116_v25 }
  0x43   :  { %v419_v36 = vmax.f32 %v387_v17, %v357_v27  ;;  %v327_v37 = vmax.f32 %v117_v35, %v264_v29  ;;  %v389_v38 = vmax.f32 %v357_v27, %v355_v5  ;;  %v168_v40 = vsel %vm72_vm0, 0.0, %v118_v31 }
  0x44   :  { %450 = vst [vmem:[%s734_s1 + $0xc0] sm:$0xff] %v418_v32  ;;  %v358_v39 = vmax.f32 %v294_v24, %v326_v33  ;;  %v215_v41 = vrot.slane %v38_v18, 1  ;;  %v216_v42 = vrot.slane %v39_v30, 1  ;;  %v296_v44 = vmax.f32 %v38_v18, 0.0 }
  0x45   :  { %451 = vst [vmem:[%s734_s1 + $0xc8] sm:$0xff] %v419_v36  ;;  %v359_v43 = vmax.f32 %v295_v26, %v327_v37  ;;  %v119_v45 = vrot.slane %v39_v30, 7  ;;  %v297_v49 = vmax.f32 %v39_v30, 0.0 }
  0x46   :  { %v420_v46 = vmax.f32 %v388_v34, %v358_v39  ;;  %v217_v47 = vsel %vm169_vm1, %v215_v41, %v216_v42  ;;  %v265_v48 = vsel %vm169_vm1, %v216_v42, 0.0  ;;  %v390_v52 = vmax.f32 %v358_v39, %v356_v23 }
  0x47   :  { %v421_v50 = vmax.f32 %v389_v38, %v359_v43  ;;  %v328_v51 = vmax.f32 %v168_v40, %v217_v47  ;;  %v120_v53 = vsel %vm72_vm0, %v118_v31, %v119_v45  ;;  %v391_v55 = vmax.f32 %v359_v43, %v357_v27 }
  0x48   :  { %452 = vst [vmem:[%s734_s1 + $0xd0] sm:$0xff] %v420_v46  ;;  %v329_v54 = vmax.f32 %v120_v53, %v265_v48 }
  0x49   :  { %453 = vst [vmem:[%s734_s1 + $0xd8] sm:$0xff] %v421_v50  ;;  %v360_v56 = vmax.f32 %v296_v44, %v328_v51 }
  0x4a   :  { %v361_v57 = vmax.f32 %v297_v49, %v329_v54 }
  0x4b   :  { %v422_v58 = vmax.f32 %v390_v52, %v360_v56  ;;  %v392_v59 = vmax.f32 %v360_v56, %v358_v39 }
  0x4c   :  { %v423_v60 = vmax.f32 %v391_v55, %v361_v57  ;;  %v393_v61 = vmax.f32 %v361_v57, %v359_v43 }
  0x4d   :  { %454 = vst [vmem:[%s734_s1 + $0xe0] sm:$0xff] %v422_v58  ;;  %v424_v62 = vmax.f32 %v392_v59, 0.0 }
  0x4e   :  { %455 = vst [vmem:[%s734_s1 + $0xe8] sm:$0xff] %v423_v60  ;;  %v425_v63 = vmax.f32 %v393_v61, 0.0 }
  0x4f   :  { %456 = vst [vmem:[%s734_s1 + $0xf0] sm:$0xff] %v424_v62 }
  0x50   :  { %457 = vst [vmem:[%s734_s1 + $0xf8] sm:$0xff] %v425_v63 }

</bundles_post_ra>
